<compile_context>
chip_gen: v7x
topology: tpu7x:2x2x1
jax: 0.10.0
libtpu: 0.0.40
codegen_flags: <defaults>
</compile_context>

<pallas_src>
import math
import functools

import jax
import jax.numpy as jnp
from jax.experimental import pallas as pl
from jax.experimental.pallas import tpu as pltpu

# ---- hyper-parameters (small, deterministic synthetic config) ----------------
HIDDEN_NEURONS = 64      # hiddenLayerNeurons
N_HIDDEN       = 3       # nHiddenLayers  (forward only uses N_HIDDEN - 1 of them)
DROPOUT_PROB   = 0.1     # unused at inference (identity)
WINDOW_SIZE    = 4       # windowSize
DEPTH          = 25
FLAT_FEATS     = WINDOW_SIZE * WINDOW_SIZE * DEPTH   # 400

H_PAD   = 128            # lane-dense hidden width (zero-padded; numerically exact)
OUT_PAD = 128            # lane-dense logits width (padded cols biased to -1e30)
MAX_TB  = 1024           # batch-tile ceiling; keeps VMEM footprint portable
NEG_BIG = -1e30          # "minus infinity" for padded logit columns


def _round_up(x, m):
    return ((x + m - 1) // m) * m


def _mlp_softmax_kernel(x_ref, w_in_ref, b_in_ref,
                        w_h_ref, b_h_ref,
                        w_out_ref, b_out_ref,
                        o_ref, *, n_layers):
    # input Linear -- NO activation (matches the PyTorch forward).
    # bf16 operands, f32 accumulation; bias/relu stay f32.
    h = jnp.dot(x_ref[...], w_in_ref[...],
                preferred_element_type=jnp.float32) + b_in_ref[...]

    # hidden layers: relu(Linear(h)); static unroll keeps LLO scheduler visibility.
    # TODO(synk): training-mode dropout (stateful PRNG mask) not implemented;
    # eval-mode forward is identity.
    for i in range(n_layers):
        h = jnp.dot(h.astype(jnp.bfloat16), w_h_ref[i],
                    preferred_element_type=jnp.float32) + b_h_ref[i]
        h = jnp.maximum(h, 0.0)

    # output Linear + softmax over dim=1.
    # Padded logit columns carry a -1e30 bias, so exp() underflows to exactly 0
    # and the denominator only sums the 2 real classes.
    logits = jnp.dot(h.astype(jnp.bfloat16), w_out_ref[...],
                     preferred_element_type=jnp.float32) + b_out_ref[...]
    m = jnp.max(logits, axis=1, keepdims=True)
    e = jnp.exp(logits - m)
    denom = jnp.sum(e, axis=1, keepdims=True)
    o_ref[...] = (e * pl.reciprocal(denom, approx=True)).astype(o_ref.dtype)


def prepare_params(params):
    """One-time lane-dense (128-wide) padding + bf16 cast of the weights.

    Hoisted out of the per-call forward so the padded copies are materialized
    in HBM once instead of on every invocation.
    """
    w_in, b_in, w_h, b_h, w_out, b_out = params
    n_layers = N_HIDDEN - 1          # forward only uses the first nHiddenLayers-1
    H = HIDDEN_NEURONS

    w_in_p  = jnp.zeros((FLAT_FEATS, H_PAD), jnp.bfloat16
                        ).at[:, :H].set(w_in.astype(jnp.bfloat16))
    b_in_p  = jnp.zeros((1, H_PAD), jnp.float32).at[:, :H].set(b_in)
    w_h_p   = jnp.zeros((n_layers, H_PAD, H_PAD), jnp.bfloat16
                        ).at[:, :H, :H].set(w_h[:n_layers].astype(jnp.bfloat16))
    b_h_p   = jnp.zeros((n_layers, 1, H_PAD), jnp.float32
                        ).at[:, :, :H].set(b_h[:n_layers])
    w_out_p = jnp.zeros((H_PAD, OUT_PAD), jnp.bfloat16
                        ).at[:H, :2].set(w_out.astype(jnp.bfloat16))
    b_out_p = jnp.full((1, OUT_PAD), NEG_BIG, jnp.float32).at[:, :2].set(b_out)
    return w_in_p, b_in_p, w_h_p, b_h_p, w_out_p, b_out_p


def _choose_tiling(batch):
    """Balanced batch tiles; >=2 tiles once batch>=32 so v7x megacore shards."""
    n_tiles = max(pl.cdiv(batch, MAX_TB), 1)
    if batch >= 32:
        n_tiles = max(n_tiles, 2)
    tb = _round_up(pl.cdiv(batch, n_tiles), 16)   # 16-row multiple for bf16 sublanes
    return tb, n_tiles


@jax.jit
def classifier_net_forward(x, prepared_params):
    """x: (B, 51, 51, 25). Returns softmax probabilities (B, 2) float32."""
    w_in_p, b_in_p, w_h_p, b_h_p, w_out_p, b_out_p = prepared_params
    n_layers = N_HIDDEN - 1

    # --- glue: window slice + flatten (matches PyTorch slicing/view) ---------
    # TODO(synk): the window gather could be fused into the kernel via
    # memory_space=pl.ANY + a strided make_async_copy if profiling still shows
    # this path HBM-bound after the bf16 cast.
    lower = 26 - int(math.ceil(WINDOW_SIZE / 2))
    upper = lower + WINDOW_SIZE
    xf = x[:, lower:upper, lower:upper, :].reshape(-1, FLAT_FEATS)
    xf = xf.astype(jnp.bfloat16)                 # bf16 HBM stream into the kernel
    batch = xf.shape[0]

    # --- balanced batch tiling -------------------------------------------------
    tb, n_tiles = _choose_tiling(batch)
    b_pad = tb * n_tiles
    if b_pad != batch:
        xf = jnp.pad(xf, ((0, b_pad - batch), (0, 0)))

    kernel = functools.partial(_mlp_softmax_kernel, n_layers=n_layers)
    const = lambda nd: (lambda i: (0,) * nd)   # weights stay VMEM-resident

    out = pl.pallas_call(
        kernel,
        out_shape=jax.ShapeDtypeStruct((b_pad, OUT_PAD), jnp.bfloat16),
        grid_spec=pltpu.PrefetchScalarGridSpec(
            num_scalar_prefetch=0,
            grid=(n_tiles,),
            in_specs=[
                pl.BlockSpec((tb, FLAT_FEATS), lambda i: (i, 0)),   # x tile
                pl.BlockSpec(w_in_p.shape,  const(2)),              # W_in
                pl.BlockSpec(b_in_p.shape,  const(2)),              # b_in
                pl.BlockSpec(w_h_p.shape,   const(3)),              # W_hidden
                pl.BlockSpec(b_h_p.shape,   const(3)),              # b_hidden
                pl.BlockSpec(w_out_p.shape, const(2)),              # W_out
                pl.BlockSpec(b_out_p.shape, const(2)),              # b_out
            ],
            out_specs=pl.BlockSpec((tb, OUT_PAD), lambda i: (i, 0)),
        ),
        compiler_params=pltpu.CompilerParams(
            dimension_semantics=("parallel",)),
    )(xf, w_in_p, b_in_p, w_h_p, b_h_p, w_out_p, b_out_p)

    return out[:batch, :2].astype(jnp.float32)


def init_params(key):
    """Deterministic parameter init mimicking nn.Linear defaults (U[-1/sqrt(fan_in), +])."""
    ks = jax.random.split(key, 6)

    def linear(kw, kb, fan_in, fan_out):
        bound = 1.0 / math.sqrt(fan_in)
        w = jax.random.uniform(kw, (fan_in, fan_out), jnp.float32, -bound, bound)
        b = jax.random.uniform(kb, (1, fan_out), jnp.float32, -bound, bound)
        return w, b

    w_in, b_in = linear(ks[0], ks[1], FLAT_FEATS, HIDDEN_NEURONS)

    kh = jax.random.split(ks[2], 2 * N_HIDDEN)
    w_h_list, b_h_list = [], []
    for i in range(N_HIDDEN):
        w, b = linear(kh[2 * i], kh[2 * i + 1], HIDDEN_NEURONS, HIDDEN_NEURONS)
        w_h_list.append(w)
        b_h_list.append(b)
    w_h = jnp.stack(w_h_list, axis=0)            # (L, H, H)
    b_h = jnp.stack(b_h_list, axis=0)            # (L, 1, H)

    w_out, b_out = linear(ks[3], ks[4], HIDDEN_NEURONS, 2)
    return w_in, b_in, w_h, b_h, w_out, b_out


def reference_forward(x, params):
    """Pure-JAX f32 reference for correctness checking."""
    w_in, b_in, w_h, b_h, w_out, b_out = params
    lower = 26 - int(math.ceil(WINDOW_SIZE / 2))
    upper = lower + WINDOW_SIZE
    h = x[:, lower:upper, lower:upper, :].reshape(-1, FLAT_FEATS)
    h = h @ w_in + b_in
    for i in range(N_HIDDEN - 1):
        h = jnp.maximum(h @ w_h[i] + b_h[i], 0.0)
    logits = h @ w_out + b_out
    return jax.nn.softmax(logits, axis=1)


if __name__ == "__main__":
    key = jax.random.PRNGKey(0)
    k_x, k_p, k_x2 = jax.random.split(key, 3)

    params = init_params(k_p)
    prepared = prepare_params(params)            # one-time padded/bf16 weights

    # --- small single-tile case (B=2) -----------------------------------------
    B = 2
    x = jax.random.normal(k_x, (B, 51, 51, DEPTH), dtype=jnp.float32)
    out = jax.block_until_ready(classifier_net_forward(x, prepared))
    ref = reference_forward(x, params)
    assert out.shape == (B, 2)
    # bf16 matmul operands + bf16 output block -> relaxed tolerance vs f32 ref
    assert jnp.allclose(out, ref, atol=2e-2, rtol=2e-2), (out, ref)
    assert jnp.allclose(jnp.sum(out, axis=1), 1.0, atol=1e-2)

    # --- multi-tile + remainder-row path (2 grid steps, padded last tile) -----
    B2 = 37
    x2 = jax.random.normal(k_x2, (B2, 51, 51, DEPTH), dtype=jnp.float32)
    out2 = jax.block_until_ready(classifier_net_forward(x2, prepared))
    ref2 = reference_forward(x2, params)
    assert out2.shape == (B2, 2)
    assert jnp.allclose(out2, ref2, atol=2e-2, rtol=2e-2), (out2, ref2)
    assert jnp.allclose(jnp.sum(out2, axis=1), 1.0, atol=1e-2)

    print("KERNEL_OK")
</pallas_src>

<mosaic_0001>
module attributes {stable_mosaic.version = 11 : i64} {
  func.func @_mlp_softmax_kernel(%arg0: i32, %arg1: memref<16x400xbf16, #tpu.memory_space<vmem>>, %arg2: memref<400x128xbf16, #tpu.memory_space<vmem>>, %arg3: memref<1x128xf32, #tpu.memory_space<vmem>>, %arg4: memref<2x128x128xbf16, #tpu.memory_space<vmem>>, %arg5: memref<2x1x128xf32, #tpu.memory_space<vmem>>, %arg6: memref<128x128xbf16, #tpu.memory_space<vmem>>, %arg7: memref<1x128xf32, #tpu.memory_space<vmem>>, %arg8: memref<16x128xbf16, #tpu.memory_space<vmem>>) attributes {dimension_semantics = [#tpu.dimension_semantics<parallel>], iteration_bounds = array<i64: 1>, scalar_prefetch = 0 : i64, scratch_operands = 0 : i64, tpu.core_type = #tpu.core_type<tc>, window_params = [{transform_indices = @transform_0, window_bounds = array<i64: 16, 400>}, {pipeline_mode = #tpu.pipeline_mode<synchronous>, transform_indices = @transform_1, window_bounds = array<i64: 400, 128>}, {pipeline_mode = #tpu.pipeline_mode<synchronous>, transform_indices = @transform_2, window_bounds = array<i64: 1, 128>}, {pipeline_mode = #tpu.pipeline_mode<synchronous>, transform_indices = @transform_3, window_bounds = array<i64: 2, 128, 128>}, {pipeline_mode = #tpu.pipeline_mode<synchronous>, transform_indices = @transform_4, window_bounds = array<i64: 2, 1, 128>}, {pipeline_mode = #tpu.pipeline_mode<synchronous>, transform_indices = @transform_5, window_bounds = array<i64: 128, 128>}, {pipeline_mode = #tpu.pipeline_mode<synchronous>, transform_indices = @transform_6, window_bounds = array<i64: 1, 128>}, {transform_indices = @transform_7, window_bounds = array<i64: 16, 128>}]} {
    %c0 = arith.constant 0 : index
    %c0_0 = arith.constant 0 : index
    %0 = vector.load %arg1[%c0, %c0_0] : memref<16x400xbf16, #tpu.memory_space<vmem>>, vector<16x400xbf16>
    %c0_1 = arith.constant 0 : index
    %c0_2 = arith.constant 0 : index
    %1 = vector.load %arg2[%c0_1, %c0_2] : memref<400x128xbf16, #tpu.memory_space<vmem>>, vector<400x128xbf16>
    %cst = arith.constant dense<0.000000e+00> : vector<16x128xf32>
    %2 = tpu.matmul %0, %1, %cst {dimension_numbers = #tpu.dot_dimension_numbers<[1], [0], [0], [1], [0, 0, 1, 1], [], []>} : vector<16x400xbf16>, vector<400x128xbf16>, vector<16x128xf32> -> vector<16x128xf32>
    %c0_3 = arith.constant 0 : index
    %c0_4 = arith.constant 0 : index
    %3 = vector.load %arg3[%c0_3, %c0_4] : memref<1x128xf32, #tpu.memory_space<vmem>>, vector<1x128xf32>
    %4 = vector.broadcast %3 : vector<1x128xf32> to vector<16x128xf32>
    %5 = arith.addf %2, %4 : vector<16x128xf32>
    %6 = arith.truncf %5 : vector<16x128xf32> to vector<16x128xbf16>
    %c0_5 = arith.constant 0 : index
    %c0_6 = arith.constant 0 : index
    %c0_7 = arith.constant 0 : index
    %7 = vector.load %arg4[%c0_5, %c0_6, %c0_7] : memref<2x128x128xbf16, #tpu.memory_space<vmem>>, vector<1x128x128xbf16>
    %8 = vector.shape_cast %7 : vector<1x128x128xbf16> to vector<128x128xbf16>
    %cst_8 = arith.constant dense<0.000000e+00> : vector<16x128xf32>
    %9 = tpu.matmul %6, %8, %cst_8 {dimension_numbers = #tpu.dot_dimension_numbers<[1], [0], [0], [1], [0, 0, 1, 1], [], []>} : vector<16x128xbf16>, vector<128x128xbf16>, vector<16x128xf32> -> vector<16x128xf32>
    %c0_9 = arith.constant 0 : index
    %c0_10 = arith.constant 0 : index
    %c0_11 = arith.constant 0 : index
    %10 = vector.load %arg5[%c0_9, %c0_10, %c0_11] : memref<2x1x128xf32, #tpu.memory_space<vmem>>, vector<1x1x128xf32>
    %11 = vector.shape_cast %10 : vector<1x1x128xf32> to vector<1x128xf32>
    %12 = vector.broadcast %11 : vector<1x128xf32> to vector<16x128xf32>
    %13 = arith.addf %9, %12 : vector<16x128xf32>
    %cst_12 = arith.constant 0.000000e+00 : f32
    %14 = vector.broadcast %cst_12 : f32 to vector<16x128xf32>
    %15 = arith.maximumf %13, %14 : vector<16x128xf32>
    %16 = arith.truncf %15 : vector<16x128xf32> to vector<16x128xbf16>
    %c1 = arith.constant 1 : index
    %c0_13 = arith.constant 0 : index
    %c0_14 = arith.constant 0 : index
    %17 = vector.load %arg4[%c1, %c0_13, %c0_14] : memref<2x128x128xbf16, #tpu.memory_space<vmem>>, vector<1x128x128xbf16>
    %18 = vector.shape_cast %17 : vector<1x128x128xbf16> to vector<128x128xbf16>
    %cst_15 = arith.constant dense<0.000000e+00> : vector<16x128xf32>
    %19 = tpu.matmul %16, %18, %cst_15 {dimension_numbers = #tpu.dot_dimension_numbers<[1], [0], [0], [1], [0, 0, 1, 1], [], []>} : vector<16x128xbf16>, vector<128x128xbf16>, vector<16x128xf32> -> vector<16x128xf32>
    %c1_16 = arith.constant 1 : index
    %c0_17 = arith.constant 0 : index
    %c0_18 = arith.constant 0 : index
    %20 = vector.load %arg5[%c1_16, %c0_17, %c0_18] : memref<2x1x128xf32, #tpu.memory_space<vmem>>, vector<1x1x128xf32>
    %21 = vector.shape_cast %20 : vector<1x1x128xf32> to vector<1x128xf32>
    %22 = vector.broadcast %21 : vector<1x128xf32> to vector<16x128xf32>
    %23 = arith.addf %19, %22 : vector<16x128xf32>
    %cst_19 = arith.constant 0.000000e+00 : f32
    %24 = vector.broadcast %cst_19 : f32 to vector<16x128xf32>
    %25 = arith.maximumf %23, %24 : vector<16x128xf32>
    %26 = arith.truncf %25 : vector<16x128xf32> to vector<16x128xbf16>
    %c0_20 = arith.constant 0 : index
    %c0_21 = arith.constant 0 : index
    %27 = vector.load %arg6[%c0_20, %c0_21] : memref<128x128xbf16, #tpu.memory_space<vmem>>, vector<128x128xbf16>
    %cst_22 = arith.constant dense<0.000000e+00> : vector<16x128xf32>
    %28 = tpu.matmul %26, %27, %cst_22 {dimension_numbers = #tpu.dot_dimension_numbers<[1], [0], [0], [1], [0, 0, 1, 1], [], []>} : vector<16x128xbf16>, vector<128x128xbf16>, vector<16x128xf32> -> vector<16x128xf32>
    %c0_23 = arith.constant 0 : index
    %c0_24 = arith.constant 0 : index
    %29 = vector.load %arg7[%c0_23, %c0_24] : memref<1x128xf32, #tpu.memory_space<vmem>>, vector<1x128xf32>
    %30 = vector.broadcast %29 : vector<1x128xf32> to vector<16x128xf32>
    %31 = arith.addf %28, %30 : vector<16x128xf32>
    %cst_25 = arith.constant dense<0xFF800000> : vector<16xf32>
    %32 = vector.multi_reduction <maximumf>, %31, %cst_25 [1] : vector<16x128xf32> to vector<16xf32>
    %33 = vector.shape_cast %32 : vector<16xf32> to vector<16x1xf32>
    %34 = vector.broadcast %33 : vector<16x1xf32> to vector<16x128xf32>
    %35 = arith.subf %31, %34 : vector<16x128xf32>
    %36 = math.exp %35 : vector<16x128xf32>
    %cst_26 = arith.constant dense<0.000000e+00> : vector<16xf32>
    %37 = vector.multi_reduction <add>, %36, %cst_26 [1] : vector<16x128xf32> to vector<16xf32>
    %38 = vector.shape_cast %37 : vector<16xf32> to vector<16x1xf32>
    %39 = tpu.reciprocal %38 {approx = true} : vector<16x1xf32> -> vector<16x1xf32>
    %40 = vector.broadcast %39 : vector<16x1xf32> to vector<16x128xf32>
    %41 = arith.mulf %36, %40 : vector<16x128xf32>
    %42 = arith.truncf %41 : vector<16x128xf32> to vector<16x128xbf16>
    %c0_27 = arith.constant 0 : index
    %c0_28 = arith.constant 0 : index
    %43 = vector.load %arg8[%c0_27, %c0_28] : memref<16x128xbf16, #tpu.memory_space<vmem>>, vector<16x128xbf16>
    tpu.vector_store %arg8[%c0_27, %c0_28], %42 {strides = array<i32>} : memref<16x128xbf16, #tpu.memory_space<vmem>>, vector<16x128xbf16>,
    return
  }
  func.func @transform_0(%arg0: i32) -> (i32, i32) {
    %c0_i32 = arith.constant 0 : i32
    %c0_i32_0 = arith.constant 0 : i32
    return %arg0, %c0_i32 : i32, i32
  }
  func.func @transform_1(%arg0: i32) -> (i32, i32) {
    %c0_i32 = arith.constant 0 : i32
    %c0_i32_0 = arith.constant 0 : i32
    %c0_i32_1 = arith.constant 0 : i32
    return %c0_i32, %c0_i32_0 : i32, i32
  }
  func.func @transform_2(%arg0: i32) -> (i32, i32) {
    %c0_i32 = arith.constant 0 : i32
    %c0_i32_0 = arith.constant 0 : i32
    %c0_i32_1 = arith.constant 0 : i32
    return %c0_i32, %c0_i32_0 : i32, i32
  }
  func.func @transform_3(%arg0: i32) -> (i32, i32, i32) {
    %c0_i32 = arith.constant 0 : i32
    %c0_i32_0 = arith.constant 0 : i32
    %c0_i32_1 = arith.constant 0 : i32
    %c0_i32_2 = arith.constant 0 : i32
    return %c0_i32, %c0_i32_0, %c0_i32_1 : i32, i32, i32
  }
  func.func @transform_4(%arg0: i32) -> (i32, i32, i32) {
    %c0_i32 = arith.constant 0 : i32
    %c0_i32_0 = arith.constant 0 : i32
    %c0_i32_1 = arith.constant 0 : i32
    %c0_i32_2 = arith.constant 0 : i32
    return %c0_i32, %c0_i32_0, %c0_i32_1 : i32, i32, i32
  }
  func.func @transform_5(%arg0: i32) -> (i32, i32) {
    %c0_i32 = arith.constant 0 : i32
    %c0_i32_0 = arith.constant 0 : i32
    %c0_i32_1 = arith.constant 0 : i32
    return %c0_i32, %c0_i32_0 : i32, i32
  }
  func.func @transform_6(%arg0: i32) -> (i32, i32) {
    %c0_i32 = arith.constant 0 : i32
    %c0_i32_0 = arith.constant 0 : i32
    %c0_i32_1 = arith.constant 0 : i32
    return %c0_i32, %c0_i32_0 : i32, i32
  }
  func.func @transform_7(%arg0: i32) -> (i32, i32) {
    %c0_i32 = arith.constant 0 : i32
    %c0_i32_0 = arith.constant 0 : i32
    return %arg0, %c0_i32 : i32, i32
  }
}

</mosaic_0001>

<bundles_post_ra>
// kernel: classifier_net_forward.1
= control target key start
LH: loop header
LB: loop body
LE: loop exit
PB: predicated region body
PF: predicated region fallthrough
CT: control target
= control target key end

     0   :  { %12 = vsyncpa [#allocation3], 0  ;;  %s1389_s0 = inlined_call_operand.vmem [shape: bf16[16,400], index: 0, kind: input, shape index: {}]   ;;  %s1390_s1 = inlined_call_operand.hbm [shape: bf16[400,128], index: 1, kind: input, shape index: {}]   ;;  %s1391_s2 = inlined_call_operand.hbm [shape: f32[1,128], index: 2, kind: input, shape index: {}]   ;;  %s1392_s3 = inlined_call_operand.hbm [shape: bf16[2,128,128], index: 3, kind: input, shape index: {}]   ;;  %s1393_s4 = inlined_call_operand.hbm [shape: f32[2,1,128], index: 4, kind: input, shape index: {}]   ;;  %s1394_s5 = inlined_call_operand.hbm [shape: bf16[128,128], index: 5, kind: input, shape index: {}]   ;;  %s1395_s6 = inlined_call_operand.hbm [shape: f32[1,128], index: 6, kind: input, shape index: {}]   ;;  %s1396_s7 = inlined_call_operand.vmem [shape: bf16[16,128], index: 7, kind: output, shape index: {}]  }
   0x1   :  { %13 = vsyncpa [#allocation5], 0 }
   0x2   :  { %14 = vsyncpa [#allocation8], 0 }
   0x3   :  { %15 = vsyncpa [#allocation11], 0  ;;  %s1194_s24 = smov [#allocation4]   ;;  %s1195_s26 = smov [#allocation7]  }
   0x4   :  { %s36_s25 = sshll.u32 %s1194_s24, 4  ;;  %s57_s27 = sshll.u32 %s1195_s26, 4  ;;  %s37_s25 = int_to_ptr.vmem [resolvable:$true] %s36_s25  ;;  %s1247_s27 = int_to_ptr.vmem [resolvable:$true] %s57_s27 }
   0x5   :  { %s1054_s30 = scalar_lea.hbm %s1391_s2, 16 }
   0x6   :  { %p1055_p0 = scmp.ne.s32.totalorder %s1391_s2, %s1054_s30  ;;  %p1058_p1 = scmp.lt.u32.totalorder %s1054_s30, %s1391_s2 }
   0x8   :  { %p1060_p2 = pnand %p1058_p1, %p1055_p0 }
   0xa   :  { %1063 = shalt.err (!%p1060_p2)
}
   0xb   :  { %s1064_s12 = scalar_lea.vmem %s37_s25, 16  ;;  %s1068_s13 = scalar_lea.vmem %s37_s25, 32 }
   0xc   :  { %p1065_p3 = scmp.ne.s32.totalorder %s37_s25, %s1064_s12  ;;  %p1069_p4 = scmp.lt.s32.totalorder %s37_s25, %s37_s25 }
   0xd   :  { %p1070_p5 = scmp.lt.s32.totalorder %s1068_s13, %s1064_s12 }
   0xf   :  { %p1071_p6 = por %p1070_p5, %p1069_p4 }
  0x11   :  { %p1072_p7 = pnand %p1071_p6, %p1065_p3 }
  0x13   :  { %1075 = shalt.err (!%p1072_p7)
}
  0x14   :  { %39 = dma.hbm_to_vmem [thread:$0]  %s1391_s2, 16, %s37_s25, [#allocation5]  }
  0x15   :  { %s1076_s18 = scalar_lea.hbm %s1393_s4, 32 }
  0x16   :  { %p1077_p8 = scmp.ne.s32.totalorder %s1393_s4, %s1076_s18  ;;  %p1080_p9 = scmp.lt.u32.totalorder %s1076_s18, %s1393_s4 }
  0x18   :  { %p1082_p10 = pnand %p1080_p9, %p1077_p8 }
  0x1a   :  { %1085 = shalt.err (!%p1082_p10)
}
  0x1b   :  { %s1086_s23 = scalar_lea.vmem %s1247_s27, 32  ;;  %p1091_p12 = scmp.lt.s32.totalorder %s1247_s27, %s1247_s27 }
  0x1c   :  { %p1087_p11 = scmp.ne.s32.totalorder %s1247_s27, %s1086_s23  ;;  %p1092_p13 = scmp.lt.s32.totalorder %s1086_s23, %s1086_s23 }
  0x1e   :  { %p1093_p0 = por %p1092_p13, %p1091_p12 }
  0x20   :  { %p1094_p1 = pnand %p1093_p0, %p1087_p11 }
  0x22   :  { %1097 = shalt.err (!%p1094_p1)
}
  0x23   :  { %s1196_s2 = smov 16   ;;  %s1197_s24 = smov 1  }
  0x24   :  { %63 = dma.hbm_to_vmem [thread:$0]  %s1393_s4, 32, %s1247_s27, [#allocation8], %s1196_s2, %s1196_s2, %s1197_s24  }
  0x25   :  { %s1198_s28 = smov [#allocation2]   ;;  %s1098_s9 = scalar_lea.hbm %s1390_s1, 3200 }
  0x26   :  { %s23_s29 = sshll.u32 %s1198_s28, 4  ;;  %p1099_p2 = scmp.ne.s32.totalorder %s1390_s1, %s1098_s9  ;;  %s24_s29 = int_to_ptr.vmem [resolvable:$true] %s23_s29 }
  0x27   :  { %p1102_p3 = scmp.lt.u32.totalorder %s1098_s9, %s1390_s1 }
  0x29   :  { %p1104_p4 = pnand %p1102_p3, %p1099_p2 }
  0x2b   :  { %1107 = shalt.err (!%p1104_p4)
}
  0x2c   :  { %s1108_s14 = scalar_lea.vmem %s24_s29, 3200  ;;  %p1113_p6 = scmp.lt.s32.totalorder %s24_s29, %s24_s29 }
  0x2d   :  { %p1109_p5 = scmp.ne.s32.totalorder %s24_s29, %s1108_s14  ;;  %p1114_p7 = scmp.lt.s32.totalorder %s1108_s14, %s1108_s14 }
  0x2f   :  { %p1115_p8 = por %p1114_p7, %p1113_p6 }
  0x31   :  { %p1116_p9 = pnand %p1115_p8, %p1109_p5 }
  0x33   :  { %1119 = shalt.err (!%p1116_p9)
}
  0x34   :  { %s1199_s4 = smov 64   ;;  %s1200_s27 = smov 4  }
  0x35   :  { %29 = dma.hbm_to_vmem [thread:$0]  %s1390_s1, 3200, %s24_s29, [#allocation3], %s1199_s4, %s1199_s4, %s1200_s27  }
  0x36   :  { %s1201_s17 = smov [#allocation6]   ;;  %s1202_s19 = smov [#allocation9]  }
  0x37   :  { %s45_s18 = sshll.u32 %s1201_s17, 4  ;;  %s69_s20 = sshll.u32 %s1202_s19, 4  ;;  %s46_s18 = int_to_ptr.vmem [resolvable:$true] %s45_s18  ;;  %s70_s20 = int_to_ptr.vmem [resolvable:$true] %s69_s20 }
  0x38   :  { %s1120_s23 = scalar_lea.hbm %s1392_s3, 2048 }
  0x39   :  { %p1121_p10 = scmp.ne.s32.totalorder %s1392_s3, %s1120_s23  ;;  %p1124_p11 = scmp.lt.u32.totalorder %s1120_s23, %s1392_s3 }
  0x3b   :  { %p1126_p12 = pnand %p1124_p11, %p1121_p10 }
  0x3d   :  { %1129 = shalt.err (!%p1126_p12)
}
  0x3e   :  { %s1130_s1 = scalar_lea.vmem %s46_s18, 2048  ;;  %p1135_p0 = scmp.lt.s32.totalorder %s46_s18, %s46_s18 }
  0x3f   :  { %p1131_p13 = scmp.ne.s32.totalorder %s46_s18, %s1130_s1  ;;  %p1136_p1 = scmp.lt.s32.totalorder %s1130_s1, %s1130_s1 }
  0x41   :  { %p1137_p2 = por %p1136_p1, %p1135_p0 }
  0x43   :  { %p1138_p3 = pnand %p1137_p2, %p1131_p13 }
  0x45   :  { %1141 = shalt.err (!%p1138_p3)
}
  0x46   :  { %51 = dma.hbm_to_vmem [thread:$0]  %s1392_s3, 2048, %s46_s18, [#allocation5], %s1199_s4, %s1199_s4, %s1200_s27  }
  0x47   :  { %s1142_s9 = scalar_lea.hbm %s1394_s5, 1024 }
  0x48   :  { %p1143_p4 = scmp.ne.s32.totalorder %s1394_s5, %s1142_s9  ;;  %p1146_p5 = scmp.lt.u32.totalorder %s1142_s9, %s1394_s5 }
  0x4a   :  { %p1148_p6 = pnand %p1146_p5, %p1143_p4 }
  0x4c   :  { %1151 = shalt.err (!%p1148_p6)
}
  0x4d   :  { %s1152_s14 = scalar_lea.vmem %s70_s20, 1024  ;;  %p1157_p8 = scmp.lt.s32.totalorder %s70_s20, %s70_s20 }
  0x4e   :  { %p1153_p7 = scmp.ne.s32.totalorder %s70_s20, %s1152_s14  ;;  %p1158_p9 = scmp.lt.s32.totalorder %s1152_s14, %s1152_s14 }
  0x50   :  { %p1159_p10 = por %p1158_p9, %p1157_p8 }
  0x52   :  { %p1160_p11 = pnand %p1159_p10, %p1153_p7 }
  0x54   :  { %1163 = shalt.err (!%p1160_p11)
}
  0x55   :  { %75 = dma.hbm_to_vmem [thread:$0]  %s1394_s5, 1024, %s70_s20, [#allocation8], %s1199_s4, %s1199_s4, %s1200_s27  }
  0x56   :  { %s1203_s16 = smov [#allocation10]   ;;  %s1164_s21 = scalar_lea.hbm %s1395_s6, 16 }
  0x57   :  { %s82_s17 = sshll.u32 %s1203_s16, 4  ;;  %p1165_p12 = scmp.ne.s32.totalorder %s1395_s6, %s1164_s21  ;;  %s83_s17 = int_to_ptr.vmem [resolvable:$true] %s82_s17 }
  0x58   :  { %p1168_p13 = scmp.lt.u32.totalorder %s1164_s21, %s1395_s6 }
  0x5a   :  { %p1170_p0 = pnand %p1168_p13, %p1165_p12 }
  0x5c   :  { %1173 = shalt.err (!%p1170_p0)
}
  0x5d   :  { %s1174_s25 = scalar_lea.vmem %s83_s17, 16  ;;  %s1178_s5 = scalar_lea.vmem %s83_s17, 32 }
  0x5e   :  { %p1175_p1 = scmp.ne.s32.totalorder %s83_s17, %s1174_s25  ;;  %p1179_p2 = scmp.lt.s32.totalorder %s83_s17, %s83_s17 }
  0x5f   :  { %p1180_p3 = scmp.lt.s32.totalorder %s1178_s5, %s1174_s25 }
  0x61   :  { %p1181_p4 = por %p1180_p3, %p1179_p2 }
  0x63   :  { %p1182_p5 = pnand %p1181_p4, %p1175_p1 }
  0x65   :  { %1185 = shalt.err (!%p1182_p5)
}
  0x66   :  { %85 = dma.hbm_to_vmem [thread:$0]  %s1395_s6, 16, %s83_s17, [#allocation11]  }
  0x67   :  { %1186 = dma.done.wait [#allocation3], 3200  }
  0x68   :  { %1187 = vsyncadd [#allocation3], 4294964096 }
  0x69   :  { %1188 = dma.done.wait [#allocation5], 2064  }
  0x6a   :  { %1189 = vsyncadd [#allocation5], 4294965232 }
  0x6b   :  { %1190 = dma.done.wait [#allocation8], 1056  }
  0x6c   :  { %1191 = vsyncadd [#allocation8], 4294966240 }
  0x6d   :  { %1192 = dma.done.wait [#allocation11], 16  }
  0x6e   :  { %1193 = vsyncadd [#allocation11], 4294967280  ;;  %v1204_v0 = vmov 0   ;;  %v991_v1 = vld [vmem:[#allocation2 + $0x40] sm:$0xff]   ;;  %v994_v4 = vld [vmem:[#allocation2 + $0x48] sm:$0xff]   ;;  %vm335_vm0 = vcmask 130048  }
  0x6f   :  { %380 = vmatprep.subr.bf16.mxu1 %v1204_v0  ;;  %v992_v2 = vld [vmem:[#allocation2 + $0x80] sm:$0xff]   ;;  %869 = vmatprep.subr.bf16.mxu0 %v991_v1  ;;  %v995_v5 = vld [vmem:[#allocation2 + $0x88] sm:$0xff]   ;;  %v997_v7 = vld [vmem:[#allocation2 + $0x50] sm:$0xff]   ;;  %v1205_v31 = vmov 0.0   ;;  %vm1206_vm1 = vmmov 0  }
  0x70   :  { %v993_v3 = vld [vmem:[#allocation2] sm:$0xff]   ;;  %381 = vmatpush1.bf16.msra.mxu1 %v992_v2  ;;  %v996_v6 = vld [vmem:[#allocation2 + $0x8] sm:$0xff]   ;;  %v998_v8 = vld [vmem:[#allocation2 + $0x90] sm:$0xff]  }
  0x71   :  { %870 = vmatpush3.bf16.msra.mxu0 %v993_v3  ;;  %382 = vmatprep.subr.bf16.mxu1 %v1204_v0  ;;  %v999_v9 = vld [vmem:[#allocation2 + $0x10] sm:$0xff]   ;;  %v1000_v10 = vld [vmem:[#allocation2 + $0x58] sm:$0xff]   ;;  %v1003_v13 = vld [vmem:[#allocation2 + $0x60] sm:$0xff]  }
  0x72   :  { %871 = vmatprep.subr.bf16.mxu0 %v994_v4  ;;  %v1001_v11 = vld [vmem:[#allocation2 + $0x98] sm:$0xff]   ;;  %v1004_v14 = vld [vmem:[#allocation2 + $0xa0] sm:$0xff]   ;;  %v1006_v16 = vld [vmem:[#allocation2 + $0x68] sm:$0xff]  }
  0x73   :  { %v1002_v12 = vld [vmem:[#allocation2 + $0x18] sm:$0xff]   ;;  %v1005_v15 = vld [vmem:[#allocation2 + $0x20] sm:$0xff]   ;;  %v1007_v17 = vld [vmem:[#allocation2 + $0xa8] sm:$0xff]  }
  0x74   :  { %383 = vmatpush1.bf16.msra.mxu1 %v995_v5  ;;  %v1008_v18 = vld [vmem:[#allocation2 + $0x28] sm:$0xff]   ;;  %v1009_v19 = vld [vmem:[#allocation2 + $0x70] sm:$0xff]   ;;  %v1012_v22 = vld [vmem:[#allocation2 + $0x78] sm:$0xff]  }
  0x75   :  { %872 = vmatpush3.bf16.msra.mxu0 %v996_v6  ;;  %384 = vmatprep.subr.bf16.mxu1 %v1204_v0  ;;  %v1010_v20 = vld [vmem:[#allocation2 + $0xb0] sm:$0xff]   ;;  %v1013_v24 = vld [vmem:[#allocation2 + $0xb8] sm:$0xff]   ;;  %v1018_v28 = vld [vmem:[#allocation2 + $0xc0] sm:$0xff]  }
  0x76   :  { %873 = vmatprep.subr.bf16.mxu0 %v997_v7  ;;  %v1011_v21 = vld [vmem:[#allocation2 + $0x30] sm:$0xff]   ;;  %v1021_v25 = vld [vmem:[%s1389_s0 + $0xc] ss:$16 sps:$4 sm:$0xff]   ;;  %v1019_v29 = vld [vmem:[%s1389_s0 + $0x8] ss:$16 sps:$4 sm:$0xff]  }
  0x77   :  { %v1017_v23 = vld [vmem:[%s1389_s0 + $0x4] ss:$16 sps:$4 sm:$0xff]   ;;  %v1014_v26 = vld [vmem:[#allocation2 + $0x38] sm:$0xff]   ;;  %832 = vmatprep.mubr.msk.bf16.mxu1 %vm335_vm0, %v1021_v25  ;;  %v1015_v27 = vld [vmem:[%s1389_s0] ss:$16 sps:$4 sm:$0xff]  }
  0x78   :  { %385 = vmatpush1.bf16.msra.mxu1 %v998_v8  ;;  %371 = vmatprep.mubr.bf16.mxu0 %v1017_v23  ;;  %v1022_v30 = vld [vmem:[#allocation6] sm:$0xff]   ;;  %v1023_v32 = vld [vmem:[#allocation6 + $0x8] sm:$0xff]   ;;  %v1024_v33 = vld [vmem:[#allocation6 + $0x10] sm:$0xff]  }
  0x79   :  { %874 = vmatpush3.bf16.msra.mxu0 %v999_v9  ;;  %386 = vmatprep.subr.bf16.mxu1 %v1204_v0  ;;  %v1025_v34 = vld [vmem:[#allocation6 + $0x18] sm:$0xff]   ;;  %v1026_v35 = vld [vmem:[#allocation6 + $0x20] sm:$0xff]   ;;  %v1027_v36 = vld [vmem:[#allocation6 + $0x28] sm:$0xff]  }
  0x7a   :  { %875 = vmatprep.subr.bf16.mxu0 %v1000_v10  ;;  %v1028_v37 = vld [vmem:[#allocation6 + $0x30] sm:$0xff]   ;;  %v1029_v38 = vld [vmem:[#allocation6 + $0x38] sm:$0xff]   ;;  %v1030_v39 = vld [vmem:[#allocation6 + $0x40] sm:$0xff]  }
  0x7b   :  { %v1031_v40 = vld [vmem:[#allocation6 + $0x48] sm:$0xff]   ;;  %v1032_v41 = vld [vmem:[#allocation6 + $0x50] sm:$0xff]   ;;  %v1033_v42 = vld [vmem:[#allocation6 + $0x58] sm:$0xff]  }
  0x7c   :  { %387 = vmatpush1.bf16.msra.mxu1 %v1001_v11  ;;  %v1034_v43 = vld [vmem:[#allocation6 + $0x60] sm:$0xff]   ;;  %v1035_v44 = vld [vmem:[#allocation6 + $0x68] sm:$0xff]   ;;  %v802_v47 = vld [vmem:[#allocation4] ss:$0 sm:$0xff] }
  0x7d   :  { %876 = vmatpush3.bf16.msra.mxu0 %v1002_v12  ;;  %388 = vmatprep.subr.bf16.mxu1 %v1204_v0  ;;  %v1036_v61 = vld [vmem:[#allocation6 + $0x70] sm:$0xff]   ;;  %v1037_v62 = vld [vmem:[#allocation6 + $0x78] sm:$0xff]   ;;  %v1038_v63 = vld [vmem:[#allocation9] sm:$0xff]  }
  0x7e   :  { %877 = vmatprep.subr.bf16.mxu0 %v1003_v13  ;;  %v1040_v1 = vld [vmem:[#allocation9 + $0x10] sm:$0xff]   ;;  %v1041_v2 = vld [vmem:[#allocation9 + $0x18] sm:$0xff]   ;;  %v1042_v3 = vld [vmem:[#allocation9 + $0x20] sm:$0xff]  }
  0x7f   :  { %v1043_v4 = vld [vmem:[#allocation9 + $0x28] sm:$0xff]   ;;  %v833_v5 = vld [vmem:[#allocation7] ss:$0 sm:$0xff] }
  0x80   :  { %389 = vmatpush1.bf16.msra.mxu1 %v1004_v14 }
  0x81   :  { %878 = vmatpush3.bf16.msra.mxu0 %v1005_v15  ;;  %390 = vmatprep.subr.bf16.mxu1 %v1204_v0  ;;  %v1044_v15 = vld [vmem:[#allocation9 + $0x30] sm:$0xff]  }
  0x82   :  { %879 = vmatprep.subr.bf16.mxu0 %v1006_v16  ;;  %v1045_v16 = vld [vmem:[#allocation9 + $0x38] sm:$0xff]  }
  0x84   :  { %391 = vmatpush1.bf16.msra.mxu1 %v1007_v17  ;;  %v842_v17 = vld [vmem:[#allocation7 + $0x1] ss:$0 sm:$0xff] }
  0x85   :  { %880 = vmatpush3.bf16.msra.mxu0 %v1008_v18  ;;  %392 = vmatprep.subr.bf16.mxu1 %v1204_v0 }
  0x86   :  { %881 = vmatprep.subr.bf16.mxu0 %v1009_v19 }
  0x88   :  { %393 = vmatpush1.bf16.msra.mxu1 %v1010_v20 }
  0x89   :  { %882 = vmatpush3.bf16.msra.mxu0 %v1011_v21  ;;  %394 = vmatprep.subr.bf16.mxu1 %v1204_v0 }
  0x8a   :  { %883 = vmatprep.subr.bf16.mxu0 %v1012_v22 }
  0x8c   :  { %395 = vmatpush1.bf16.msra.mxu1 %v1013_v24 }
  0x8d   :  { %884 = vmatpush3.bf16.msra.mxu0 %v1014_v26  ;;  %396 = vmatprep.subr.bf16.mxu1 %v1204_v0  ;;  %v1039_v0 = vld [vmem:[#allocation9 + $0x8] sm:$0xff]  }
  0x8e   :  { %918 = vmatprep.subr.bf16.mxu0 %v1205_v31 }
  0x90   :  { %372 = vmatmul.mubr.bf16.vlgmr.msra.gmra.mrb[0].mxu0 %v1015_v27  ;;  %397 = vmatpush1.bf16.msra.mxu1 %v1018_v28  ;;  %v851_v27 = vld [vmem:[#allocation10] ss:$0 sm:$0xff] }
  0x91   :  { %919 = vmatpush3.bf16.msra.mxu0 %v1022_v30  ;;  %938 = vmatprep.subr.bf16.mxu1 %v1205_v31 }
  0x92   :  { %920 = vmatprep.subr.bf16.mxu0 %v1205_v31  ;;  %934 = vmatprep.mubr.msk.bf16.mxu0 %vm1206_vm1, %v1205_v31 }
  0x93   :  { %413 = vmatmul.mubr.bf16.vlgmr.msra.gmra.mrb[0].mxu1 %v1019_v29 }
  0x94   :  { %954 = vmatprep.mubr.msk.bf16.mxu1 %vm1206_vm1, %v1205_v31  ;;  %939 = vmatpush3.bf16.msra.mxu1 %v1030_v39 }
  0x95   :  { %921 = vmatpush3.bf16.msra.mxu0 %v1023_v32  ;;  %940 = vmatprep.subr.bf16.mxu1 %v1205_v31 }
  0x96   :  { %922 = vmatprep.subr.bf16.mxu0 %v1205_v31 }
  0x98   :  { %941 = vmatpush3.bf16.msra.mxu1 %v1031_v40 }
  0x99   :  { %923 = vmatpush3.bf16.msra.mxu0 %v1024_v33  ;;  %942 = vmatprep.subr.bf16.mxu1 %v1205_v31 }
  0x9a   :  { %924 = vmatprep.subr.bf16.mxu0 %v1205_v31 }
  0x9c   :  { %943 = vmatpush3.bf16.msra.mxu1 %v1032_v41 }
  0x9d   :  { %925 = vmatpush3.bf16.msra.mxu0 %v1025_v34  ;;  %944 = vmatprep.subr.bf16.mxu1 %v1205_v31 }
  0x9e   :  { %926 = vmatprep.subr.bf16.mxu0 %v1205_v31 }
  0xa0   :  { %945 = vmatpush3.bf16.msra.mxu1 %v1033_v42 }
  0xa1   :  { %927 = vmatpush3.bf16.msra.mxu0 %v1026_v35  ;;  %946 = vmatprep.subr.bf16.mxu1 %v1205_v31 }
  0xa2   :  { %928 = vmatprep.subr.bf16.mxu0 %v1205_v31 }
  0xa4   :  { %947 = vmatpush3.bf16.msra.mxu1 %v1034_v43 }
  0xa5   :  { %929 = vmatpush3.bf16.msra.mxu0 %v1027_v36  ;;  %948 = vmatprep.subr.bf16.mxu1 %v1205_v31 }
  0xa6   :  { %930 = vmatprep.subr.bf16.mxu0 %v1205_v31 }
  0xa8   :  { %949 = vmatpush3.bf16.msra.mxu1 %v1035_v44 }
  0xa9   :  { %931 = vmatpush3.bf16.msra.mxu0 %v1028_v37  ;;  %950 = vmatprep.subr.bf16.mxu1 %v1205_v31 }
  0xaa   :  { %932 = vmatprep.subr.bf16.mxu0 %v1205_v31 }
  0xac   :  { %951 = vmatpush3.bf16.msra.mxu1 %v1036_v61 }
  0xad   :  { %933 = vmatpush3.bf16.msra.mxu0 %v1029_v38  ;;  %952 = vmatprep.subr.bf16.mxu1 %v1205_v31 }
  0xae   :  { %958 = vmatprep.subr.bf16.mxu0 %v1205_v31 }
  0xb0   :  { %953 = vmatpush3.bf16.msra.mxu1 %v1037_v62 }
 0x163   :  { %v885_v45 = vpop.f32.mrb[0].mxu0 }
 0x164   :  { %v886_v46 = vpop.f32.mrb[1].mxu0 }
 0x165   :  { %v887_v48 = vadd.f32 %v886_v46, %v885_v45  ;;  %v888_v49 = vpop.f32.mrb[2].mxu0 }
 0x166   :  { %v889_v50 = vpop.f32.mrb[3].mxu0  ;;  %v414_v51 = vpop.f32.mrb[0].mxu1 }
 0x167   :  { %v890_v52 = vadd.f32 %v889_v50, %v888_v49  ;;  %v374_v53 = vadd.f32 %v887_v48, %v802_v47  ;;  %v416_v54 = vpop.f32.mrb[1].mxu1 }
 0x168   :  { %v417_v55 = vpop.f32.mrb[2].mxu1 }
 0x169   :  { %v415_v56 = vadd.f32 %v414_v51, %v374_v53  ;;  %v377_v57 = vadd.f32 %v890_v52, %v802_v47  ;;  %v419_v58 = vpop.f32.mrb[3].mxu1 }
 0x16b   :  { %v418_v59 = vadd.f32 %v417_v55, %v377_v57 }
 0x16d   :  { %v421_v60 = vpack.c.bf16 %v418_v59, %v415_v56 }
 0x16f   :  { %935 = vmatmul.mubr.bf16.vlgmr.msra.gmra.mrb[4].mxu0 %v421_v60 }
 0x170   :  { %974 = vmatprep.mubr.msk.bf16.mxu0 %vm1206_vm1, %v1205_v31  ;;  %959 = vmatpush3.bf16.msra.mxu0 %v1038_v63 }
 0x171   :  { %960 = vmatprep.subr.bf16.mxu0 %v1205_v31 }
 0x174   :  { %961 = vmatpush3.bf16.msra.mxu0 %v1039_v0 }
 0x175   :  { %962 = vmatprep.subr.bf16.mxu0 %v1205_v31 }
 0x178   :  { %963 = vmatpush3.bf16.msra.mxu0 %v1040_v1 }
 0x179   :  { %964 = vmatprep.subr.bf16.mxu0 %v1205_v31 }
 0x17c   :  { %965 = vmatpush3.bf16.msra.mxu0 %v1041_v2 }
 0x17d   :  { %966 = vmatprep.subr.bf16.mxu0 %v1205_v31 }
 0x180   :  { %967 = vmatpush3.bf16.msra.mxu0 %v1042_v3 }
 0x181   :  { %968 = vmatprep.subr.bf16.mxu0 %v1205_v31 }
 0x184   :  { %969 = vmatpush3.bf16.msra.mxu0 %v1043_v4 }
 0x185   :  { %970 = vmatprep.subr.bf16.mxu0 %v1205_v31 }
 0x188   :  { %971 = vmatpush3.bf16.msra.mxu0 %v1044_v15 }
 0x189   :  { %972 = vmatprep.subr.bf16.mxu0 %v1205_v31 }
 0x18c   :  { %973 = vmatpush3.bf16.msra.mxu0 %v1045_v16 }
 0x242   :  { %v527_v6 = vpop.f32.mrb[4].mxu0 }
 0x243   :  { %v528_v7 = vadd.f32 %v833_v5, %v527_v6  ;;  %v936_v8 = vpop.f32.mrb[5].mxu0 }
 0x244   :  { %v530_v9 = vpop.f32.mrb[6].mxu0 }
 0x245   :  { %v531_v10 = vadd.f32 %v833_v5, %v530_v9  ;;  %v937_v11 = vpop.f32.mrb[7].mxu0  ;;  %v534_v12 = vmax.f32 %v528_v7, 0.0 }
 0x247   :  { %v535_v13 = vmax.f32 %v531_v10, 0.0 }
 0x249   :  { %v536_v14 = vpack.c.bf16 %v535_v13, %v534_v12 }
 0x24b   :  { %955 = vmatmul.mubr.bf16.vlgmr.msra.gmra.mrb[4].mxu1 %v536_v14 }
 0x31e   :  { %v644_v18 = vpop.f32.mrb[4].mxu1 }
 0x31f   :  { %v645_v19 = vadd.f32 %v842_v17, %v644_v18  ;;  %v956_v20 = vpop.f32.mrb[5].mxu1 }
 0x320   :  { %v647_v21 = vpop.f32.mrb[6].mxu1 }
 0x321   :  { %v648_v22 = vadd.f32 %v842_v17, %v647_v21  ;;  %v957_v23 = vpop.f32.mrb[7].mxu1  ;;  %v651_v24 = vmax.f32 %v645_v19, 0.0 }
 0x323   :  { %v652_v25 = vmax.f32 %v648_v22, 0.0 }
 0x325   :  { %v653_v26 = vpack.c.bf16 %v652_v25, %v651_v24 }
 0x327   :  { %975 = vmatmul.mubr.bf16.vlgmr.msra.gmra.mrb[8].mxu0 %v653_v26 }
 0x3fa   :  { %v759_v28 = vpop.f32.mrb[8].mxu0 }
 0x3fb   :  { %v760_v29 = vadd.f32 %v851_v27, %v759_v28  ;;  %v976_v30 = vpop.f32.mrb[9].mxu0 }
 0x3fc   :  { %v762_v32 = vpop.f32.mrb[10].mxu0 }
 0x3fd   :  { %766 = vmax.xlane.f32.xlu0 %v760_v29  ;;  %v977_v31 = vpop.f32.mrb[11].mxu0  ;;  %v763_v33 = vadd.f32 %v851_v27, %v762_v32 }
 0x401   :  { %768 = vmax.xlane.f32.xlu0 %v763_v33 }
 0x48a   :  { %v767_v34 = vpop.xlane.xlu0 %766 }
 0x48b   :  { %v770_v35 = vsub.f32 %v760_v29, %v767_v34 }
 0x48d   :  { %v772_v36 = vmul.f32 1.442695, %v770_v35 }
 0x48e   :  { %v769_v37 = vpop.xlane.xlu0 %768 }
 0x48f   :  { %1046 = vpow2.f32 %v772_v36  ;;  %v771_v38 = vsub.f32 %v763_v33, %v769_v37 }
 0x491   :  { %v774_v39 = vmul.f32 1.442695, %v771_v38 }
 0x493   :  { %1048 = vpow2.f32 %v774_v39 }
 0x499   :  { %v1047_v40 = vpop.eup %1046 }
 0x49a   :  { %776 = vadd.xlane.f32.xlu1 %v1047_v40 }
 0x49d   :  { %v1049_v41 = vpop.eup %1048 }
 0x49e   :  { %778 = vadd.xlane.f32.xlu1 %v1049_v41 }
 0x527   :  { %v777_v42 = vpop.xlane.xlu1 %776 }
 0x528   :  { %1050 = vrcp.f32 %v777_v42 }
 0x52b   :  { %v779_v43 = vpop.xlane.xlu1 %778 }
 0x52c   :  { %1052 = vrcp.f32 %v779_v43 }
 0x532   :  { %v1051_v44 = vpop.eup %1050 }
 0x533   :  { %v782_v46 = vmul.f32 %v1051_v44, %v1047_v40 }
 0x536   :  { %v1053_v45 = vpop.eup %1052 }
 0x537   :  { %v783_v47 = vmul.f32 %v1053_v45, %v1049_v41 }
 0x539   :  { %v867_v48 = vpack.c.bf16 %v783_v47, %v782_v46 }
 0x53b   :  { %868 = vst [vmem:[%s1396_s7] sm:$0xff] %v867_v48  }
 0x53c   :  { %798 = vsyncpa [#allocation3], 1 }
 0x53d   :  { %799 = vsyncpa [#allocation5], 1 }
 0x53e   :  { %800 = vsyncpa [#allocation8], 1 }
 0x53f   :  { %801 = vsyncpa [#allocation11], 1 }

</bundles_post_ra>
